<compile_context>
chip_gen: v6e
topology: v6e:2x2x1
jax: 0.10.0
libtpu: 0.0.40
codegen_flags: <defaults>
</compile_context>

<pallas_src>
import math
import functools

import numpy as np
import jax
import jax.numpy as jnp
from jax import lax
from jax.experimental import pallas as pl
from jax.experimental.pallas import tpu as pltpu


def _round_up(x, m):
    return (x + m - 1) // m * m


# ----------------------------- Pallas kernel --------------------------------
def action_embedding_kernel(
    act_ref,    # [T, n_box + 1]   float32  (box actions | discrete idx as float)
    mask_ref,   # [T, 1]           float32  1.0 keep / 0.0 reset
    inv_ref,    # [1, n_box]       float32  2 / (high - low)
    off_ref,    # [1, n_box]       float32  1 - low * 2/(high-low)
    w_ref,      # [n_box, OUT_PAD] float32  block-diagonal freq matrix (zeros elsewhere)
    b_ref,      # [1, OUT_PAD]     float32  pi/2 on the cos half, zeros elsewhere
    tab_ref,    # [8, OUT_PAD]     float32  embedding table placed at its output offset
    out_ref,    # [T, OUT_PAD]     float32
):
    n_box = inv_ref.shape[1]
    mask = mask_ref[...]                                        # [T, 1]

    # ---- BoxActionEmbedding ----
    box = act_ref[:, :n_box] * mask                             # masked_fill_(~masks, 0)
    x = jnp.clip(box * inv_ref[...] + off_ref[...], -1.0, 1.0)  # normalize + clamp

    # Fourier features via a single MXU matmul; cos folded as sin(x + pi/2).
    # Columns past the sin||cos slab have zero weight & bias -> sin(0) = 0 there.
    ff = jnp.sin(jnp.dot(x, w_ref[...], preferred_element_type=jnp.float32)
                 + b_ref[...])                                  # [T, OUT_PAD]

    # ---- DiscreteActionEmbedding: one-hot @ padded table on the MXU ----
    idx = act_ref[:, n_box:n_box + 1].astype(jnp.int32) + 1     # action.long() + 1
    idx = jnp.where(mask > 0.0, idx, 0)                         # masked_fill_(~masks, 0)
    T = act_ref.shape[0]
    n_rows = tab_ref.shape[0]
    rows = lax.broadcasted_iota(jnp.int32, (T, n_rows), 1)
    onehot = (rows == idx).astype(jnp.float32)                  # [T, 8]
    disc = jnp.dot(onehot, tab_ref[...],
                   preferred_element_type=jnp.float32)          # [T, OUT_PAD]

    # The two slabs occupy disjoint (zero-padded) column ranges, so their sum is the
    # concatenated output -> one lane-dense full-width store.
    out_ref[...] = ff + disc


# ------------------------------- Wrapper -------------------------------------
class ActionEmbeddingPallas:
    """Pallas port of ActionEmbedding for Dict(Box(2), Discrete(4))."""

    def __init__(self, *, box_low, box_high, n_discrete, dim_per_action=32,
                 key=None, tile_b=512):
        self.n_box = int(np.asarray(box_low).shape[0])
        self.ff_bands = dim_per_action // 2
        self.dim_per_action = dim_per_action
        self.n_discrete = n_discrete
        self.box_output = self.ff_bands * 2 * self.n_box
        self.output_size = self.box_output + dim_per_action
        self.out_pad = _round_up(self.output_size, 128)          # lane-dense output
        self.tile_b = tile_b

        low = np.asarray(box_low, np.float32).reshape(1, self.n_box)
        high = np.asarray(box_high, np.float32).reshape(1, self.n_box)
        inv = 2.0 / (high - low)
        off = 1.0 - low * inv                                    # folded affine constant
        freqs = (2.0 ** np.arange(self.ff_bands, dtype=np.float32)) * math.pi

        # Block-diagonal frequency matrix + pi/2 bias (cos via sin(x + pi/2)).
        F = self.ff_bands
        W = np.zeros((self.n_box, self.out_pad), np.float32)
        for i in range(self.n_box):
            W[i, i * F:(i + 1) * F] = freqs                              # sin half
            W[i, self.n_box * F + i * F: self.n_box * F + (i + 1) * F] = freqs  # cos half
        bias = np.zeros((1, self.out_pad), np.float32)
        bias[0, self.n_box * F: 2 * self.n_box * F] = math.pi / 2.0

        # nn.Embedding(n+1, dim_per_action) -- deterministic synthetic init.
        if key is None:
            key = jax.random.PRNGKey(0)
        table = jax.random.normal(key, (n_discrete + 1, dim_per_action),
                                  dtype=jnp.float32)
        n_rows_pad = _round_up(n_discrete + 1, 8)                # sublane-aligned K
        tab_pad = jnp.zeros((n_rows_pad, self.out_pad), jnp.float32)
        tab_pad = tab_pad.at[:n_discrete + 1,
                             self.box_output:self.box_output + dim_per_action].set(table)

        self.inv = jnp.asarray(inv)
        self.off = jnp.asarray(off)
        self.W = jnp.asarray(W)
        self.bias = jnp.asarray(bias)
        self.table_pad = tab_pad

        # Kept only for the pure-JAX reference check.
        self.low = jnp.asarray(low)
        self.inv_scale = jnp.asarray(inv)
        self.freqs = jnp.asarray(freqs).reshape(1, F)
        self.table = table

    @functools.partial(jax.jit, static_argnums=0)
    def __call__(self, action, masks=None):
        B = action.shape[0]
        if masks is None:
            masks = jnp.ones((B, 1), jnp.float32)
        masks = masks.astype(jnp.float32).reshape(B, 1)
        action = action.astype(jnp.float32)

        # Batch tiling: multiple of 8, capped at tile_b; pad B up to a whole number
        # of tiles (padded rows have mask 0 -> row 0 of the table; sliced off below).
        tile_b = min(self.tile_b, _round_up(B, 8))
        Bp = _round_up(B, tile_b)
        if Bp != B:
            action = jnp.pad(action, ((0, Bp - B), (0, 0)))
            masks = jnp.pad(masks, ((0, Bp - B), (0, 0)))

        n_tot = action.shape[1]
        n_rows = self.table_pad.shape[0]
        grid = (Bp // tile_b,)

        out = pl.pallas_call(
            action_embedding_kernel,
            out_shape=jax.ShapeDtypeStruct((Bp, self.out_pad), jnp.float32),
            grid_spec=pltpu.PrefetchScalarGridSpec(
                num_scalar_prefetch=0,
                grid=grid,
                in_specs=[
                    # per-tile operands
                    pl.BlockSpec((tile_b, n_tot), lambda i: (i, 0)),
                    pl.BlockSpec((tile_b, 1), lambda i: (i, 0)),
                    # grid-invariant constants (stay VMEM-resident, no re-DMA per step)
                    pl.BlockSpec((1, self.n_box), lambda i: (0, 0)),
                    pl.BlockSpec((1, self.n_box), lambda i: (0, 0)),
                    pl.BlockSpec((self.n_box, self.out_pad), lambda i: (0, 0)),
                    pl.BlockSpec((1, self.out_pad), lambda i: (0, 0)),
                    pl.BlockSpec((n_rows, self.out_pad), lambda i: (0, 0)),
                ],
                out_specs=pl.BlockSpec((tile_b, self.out_pad), lambda i: (i, 0)),
            ),
            compiler_params=pltpu.CompilerParams(
                dimension_semantics=("parallel",)),   # megacore sharding on v7x
        )(action, masks, self.inv, self.off, self.W, self.bias, self.table_pad)

        return out[:B, :self.output_size]


# ------------------------- Pure-JAX reference --------------------------------
def reference(action, masks, low, high, freqs, table, n_box):
    m = masks.astype(jnp.float32).reshape(action.shape[0], 1)
    a = action[:, :n_box].astype(jnp.float32) * m
    x = jnp.clip((a - low) * (2.0 / (high - low)) + 1.0, -1.0, 1.0)
    phase = (x[..., None] * freqs.reshape(-1)).reshape(x.shape[0], -1)
    box_emb = jnp.concatenate([jnp.sin(phase), jnp.cos(phase)], axis=-1)
    idx = action[:, n_box].astype(jnp.int32) + 1
    idx = jnp.where(m[:, 0] > 0.0, idx, 0)
    disc_emb = table[idx]
    return jnp.concatenate([box_emb, disc_emb], axis=-1)


# --------------------------------- Main ---------------------------------------
if __name__ == "__main__":
    key = jax.random.PRNGKey(0)
    k_tab, k_box, k_disc, k_mask = jax.random.split(key, 4)

    B = 8
    dim_per_action = 32
    box_low = jnp.array([-1.0, 0.0], jnp.float32)
    box_high = jnp.array([1.0, 2.0], jnp.float32)
    n_discrete = 4

    emb = ActionEmbeddingPallas(
        box_low=box_low, box_high=box_high,
        n_discrete=n_discrete, dim_per_action=dim_per_action, key=k_tab)

    # action: [B, 3] -> cols 0..1 continuous (box), col 2 discrete index (stored as float)
    box_vals = jax.random.uniform(
        k_box, (B, 2), minval=box_low, maxval=box_high, dtype=jnp.float32)
    disc_vals = jax.random.randint(k_disc, (B, 1), 0, n_discrete).astype(jnp.float32)
    action = jnp.concatenate([box_vals, disc_vals], axis=-1)      # [8, 3]
    masks = (jax.random.uniform(k_mask, (B, 1)) > 0.3).astype(jnp.float32)  # [8, 1]

    out = emb(action, masks)
    out = jax.block_until_ready(out)

    ref = reference(action, masks, emb.low, emb.low + 2.0 / emb.inv_scale,
                    emb.freqs, emb.table, emb.n_box)
    assert out.shape == (B, emb.output_size), out.shape
    assert jnp.allclose(out, ref, rtol=1e-3, atol=1e-3), float(jnp.abs(out - ref).max())

    print("KERNEL_OK")
</pallas_src>

<mosaic_0001>
module attributes {stable_mosaic.version = 11 : i64} {
  func.func @action_embedding_kernel(%arg0: i32, %arg1: memref<8x3xf32, #tpu.memory_space<vmem>>, %arg2: memref<8x1xf32, #tpu.memory_space<vmem>>, %arg3: memref<1x2xf32, #tpu.memory_space<vmem>>, %arg4: memref<1x2xf32, #tpu.memory_space<vmem>>, %arg5: memref<2x128xf32, #tpu.memory_space<vmem>>, %arg6: memref<1x128xf32, #tpu.memory_space<vmem>>, %arg7: memref<8x128xf32, #tpu.memory_space<vmem>>, %arg8: memref<8x128xf32, #tpu.memory_space<vmem>>) attributes {dimension_semantics = [#tpu.dimension_semantics<parallel>], iteration_bounds = array<i64: 1>, scalar_prefetch = 0 : i64, scratch_operands = 0 : i64, tpu.core_type = #tpu.core_type<tc>, window_params = [{transform_indices = @transform_0, window_bounds = array<i64: 8, 3>}, {transform_indices = @transform_1, window_bounds = array<i64: 8, 1>}, {pipeline_mode = #tpu.pipeline_mode<synchronous>, transform_indices = @transform_2, window_bounds = array<i64: 1, 2>}, {pipeline_mode = #tpu.pipeline_mode<synchronous>, transform_indices = @transform_3, window_bounds = array<i64: 1, 2>}, {pipeline_mode = #tpu.pipeline_mode<synchronous>, transform_indices = @transform_4, window_bounds = array<i64: 2, 128>}, {pipeline_mode = #tpu.pipeline_mode<synchronous>, transform_indices = @transform_5, window_bounds = array<i64: 1, 128>}, {pipeline_mode = #tpu.pipeline_mode<synchronous>, transform_indices = @transform_6, window_bounds = array<i64: 8, 128>}, {transform_indices = @transform_7, window_bounds = array<i64: 8, 128>}]} {
    %c0 = arith.constant 0 : index
    %c0_0 = arith.constant 0 : index
    %0 = vector.load %arg2[%c0, %c0_0] : memref<8x1xf32, #tpu.memory_space<vmem>>, vector<8x1xf32>
    %c0_1 = arith.constant 0 : index
    %c0_2 = arith.constant 0 : index
    %1 = vector.load %arg1[%c0_1, %c0_2] : memref<8x3xf32, #tpu.memory_space<vmem>>, vector<8x2xf32>
    %2 = vector.broadcast %0 : vector<8x1xf32> to vector<8x2xf32>
    %3 = arith.mulf %1, %2 : vector<8x2xf32>
    %c0_3 = arith.constant 0 : index
    %c0_4 = arith.constant 0 : index
    %4 = vector.load %arg3[%c0_3, %c0_4] : memref<1x2xf32, #tpu.memory_space<vmem>>, vector<1x2xf32>
    %5 = vector.broadcast %4 : vector<1x2xf32> to vector<8x2xf32>
    %6 = arith.mulf %3, %5 : vector<8x2xf32>
    %c0_5 = arith.constant 0 : index
    %c0_6 = arith.constant 0 : index
    %7 = vector.load %arg4[%c0_5, %c0_6] : memref<1x2xf32, #tpu.memory_space<vmem>>, vector<1x2xf32>
    %8 = vector.broadcast %7 : vector<1x2xf32> to vector<8x2xf32>
    %9 = arith.addf %6, %8 : vector<8x2xf32>
    %cst = arith.constant -1.000000e+00 : f32
    %cst_7 = arith.constant 1.000000e+00 : f32
    %10 = vector.broadcast %cst : f32 to vector<8x2xf32>
    %11 = arith.maximumf %10, %9 : vector<8x2xf32>
    %12 = vector.broadcast %cst_7 : f32 to vector<8x2xf32>
    %13 = arith.minimumf %12, %11 : vector<8x2xf32>
    %c0_8 = arith.constant 0 : index
    %c0_9 = arith.constant 0 : index
    %14 = vector.load %arg5[%c0_8, %c0_9] : memref<2x128xf32, #tpu.memory_space<vmem>>, vector<2x128xf32>
    %cst_10 = arith.constant dense<0.000000e+00> : vector<8x128xf32>
    %15 = tpu.matmul %13, %14, %cst_10 {dimension_numbers = #tpu.dot_dimension_numbers<[1], [0], [0], [1], [0, 0, 1, 1], [], []>} : vector<8x2xf32>, vector<2x128xf32>, vector<8x128xf32> -> vector<8x128xf32>
    %c0_11 = arith.constant 0 : index
    %c0_12 = arith.constant 0 : index
    %16 = vector.load %arg6[%c0_11, %c0_12] : memref<1x128xf32, #tpu.memory_space<vmem>>, vector<1x128xf32>
    %17 = vector.broadcast %16 : vector<1x128xf32> to vector<8x128xf32>
    %18 = arith.addf %15, %17 : vector<8x128xf32>
    %19 = math.sin %18 : vector<8x128xf32>
    %c0_13 = arith.constant 0 : index
    %c2 = arith.constant 2 : index
    %20 = vector.load %arg1[%c0_13, %c2] : memref<8x3xf32, #tpu.memory_space<vmem>>, vector<8x1xf32>
    %21 = arith.fptosi %20 : vector<8x1xf32> to vector<8x1xi32>
    %c1_i32 = arith.constant 1 : i32
    %22 = vector.broadcast %c1_i32 : i32 to vector<8x1xi32>
    %23 = arith.addi %21, %22 : vector<8x1xi32>
    %cst_14 = arith.constant 0.000000e+00 : f32
    %24 = vector.broadcast %cst_14 : f32 to vector<8x1xf32>
    %25 = arith.cmpf ogt, %0, %24 : vector<8x1xf32>
    %c0_i32 = arith.constant 0 : i32
    %26 = vector.broadcast %c0_i32 : i32 to vector<8x1xi32>
    %27 = arith.select %25, %23, %26 : vector<8x1xi1>, vector<8x1xi32>
    %28 = tpu.iota {dimensions = array<i32: 1>} : vector<8x8xi32>
    %29 = vector.broadcast %27 : vector<8x1xi32> to vector<8x8xi32>
    %30 = arith.cmpi eq, %28, %29 : vector<8x8xi32>
    %31 = arith.extui %30 : vector<8x8xi1> to vector<8x8xi32>
    %32 = arith.sitofp %31 : vector<8x8xi32> to vector<8x8xf32>
    %c0_15 = arith.constant 0 : index
    %c0_16 = arith.constant 0 : index
    %33 = vector.load %arg7[%c0_15, %c0_16] : memref<8x128xf32, #tpu.memory_space<vmem>>, vector<8x128xf32>
    %cst_17 = arith.constant dense<0.000000e+00> : vector<8x128xf32>
    %34 = tpu.matmul %32, %33, %cst_17 {dimension_numbers = #tpu.dot_dimension_numbers<[1], [0], [0], [1], [0, 0, 1, 1], [], []>} : vector<8x8xf32>, vector<8x128xf32>, vector<8x128xf32> -> vector<8x128xf32>
    %35 = arith.addf %19, %34 : vector<8x128xf32>
    %c0_18 = arith.constant 0 : index
    %c0_19 = arith.constant 0 : index
    %36 = vector.load %arg8[%c0_18, %c0_19] : memref<8x128xf32, #tpu.memory_space<vmem>>, vector<8x128xf32>
    tpu.vector_store %arg8[%c0_18, %c0_19], %35 {strides = array<i32>} : memref<8x128xf32, #tpu.memory_space<vmem>>, vector<8x128xf32>,
    return
  }
  func.func @transform_0(%arg0: i32) -> (i32, i32) {
    %c0_i32 = arith.constant 0 : i32
    %c0_i32_0 = arith.constant 0 : i32
    return %arg0, %c0_i32 : i32, i32
  }
  func.func @transform_1(%arg0: i32) -> (i32, i32) {
    %c0_i32 = arith.constant 0 : i32
    %c0_i32_0 = arith.constant 0 : i32
    return %arg0, %c0_i32 : i32, i32
  }
  func.func @transform_2(%arg0: i32) -> (i32, i32) {
    %c0_i32 = arith.constant 0 : i32
    %c0_i32_0 = arith.constant 0 : i32
    %c0_i32_1 = arith.constant 0 : i32
    return %c0_i32, %c0_i32_0 : i32, i32
  }
  func.func @transform_3(%arg0: i32) -> (i32, i32) {
    %c0_i32 = arith.constant 0 : i32
    %c0_i32_0 = arith.constant 0 : i32
    %c0_i32_1 = arith.constant 0 : i32
    return %c0_i32, %c0_i32_0 : i32, i32
  }
  func.func @transform_4(%arg0: i32) -> (i32, i32) {
    %c0_i32 = arith.constant 0 : i32
    %c0_i32_0 = arith.constant 0 : i32
    %c0_i32_1 = arith.constant 0 : i32
    return %c0_i32, %c0_i32_0 : i32, i32
  }
  func.func @transform_5(%arg0: i32) -> (i32, i32) {
    %c0_i32 = arith.constant 0 : i32
    %c0_i32_0 = arith.constant 0 : i32
    %c0_i32_1 = arith.constant 0 : i32
    return %c0_i32, %c0_i32_0 : i32, i32
  }
  func.func @transform_6(%arg0: i32) -> (i32, i32) {
    %c0_i32 = arith.constant 0 : i32
    %c0_i32_0 = arith.constant 0 : i32
    %c0_i32_1 = arith.constant 0 : i32
    return %c0_i32, %c0_i32_0 : i32, i32
  }
  func.func @transform_7(%arg0: i32) -> (i32, i32) {
    %c0_i32 = arith.constant 0 : i32
    %c0_i32_0 = arith.constant 0 : i32
    return %arg0, %c0_i32 : i32, i32
  }
}

</mosaic_0001>

<bundles_post_ra>
// kernel: a_call__.1
= control target key start
LH: loop header
LB: loop body
LE: loop exit
PB: predicated region body
PF: predicated region fallthrough
CT: control target
= control target key end

     0   :  { %v419_v2 = vmov 0   ;;  %s515_s0 = inlined_call_operand.vmem [shape: f32[8,3], index: 0, kind: input, shape index: {}]   ;;  %s516_s1 = inlined_call_operand.vmem [shape: f32[8,1], index: 1, kind: input, shape index: {}]   ;;  %s517_s2 = inlined_call_operand.vmem [shape: f32[1,2], index: 2, kind: input, shape index: {}]   ;;  %s518_s3 = inlined_call_operand.vmem [shape: f32[1,2], index: 3, kind: input, shape index: {}]   ;;  %s519_s4 = inlined_call_operand.vmem [shape: f32[2,128], index: 4, kind: input, shape index: {}]   ;;  %s520_s5 = inlined_call_operand.vmem [shape: f32[1,128], index: 5, kind: input, shape index: {}]   ;;  %s521_s6 = inlined_call_operand.vmem [shape: f32[8,128], index: 6, kind: input, shape index: {}]   ;;  %s522_s7 = inlined_call_operand.hbm [shape: f32[8,128], index: 7, kind: output, shape index: {}]  }
   0x1   :  { %v27_v0 = vld [vmem:[%s516_s1] sm:$0xff]  ;;  %391 = vset.pattern.permute.xlu0 %v419_v2  ;;  %392 = vset.pattern.permute.xlu1 %v419_v2 }
   0x2   :  { %v28_v1 = vld [vmem:[%s515_s0] sm:$0xff] }
   0x3   :  { %v378_v3 = vtrunc.f32 %v28_v1 }
   0x4   :  { %12 = vsyncpa [#allocation3], 0  ;;  %31 = vperm.xlu0 %391, %v27_v0   ;;  %v420_v5 = vmov 0.0   ;;  %v53_v6 = vld [vmem:[%s519_s4] sm:$0x3]  ;;  %vm65_vm0 = vcmask 1041408   ;;  %v249_v18 = vlaneseq }
   0x5   :  { %v379_v4 = vcvt.f32.s32 %v378_v3  ;;  %364 = vmatprep.subr.mxu0 %v420_v5  ;;  %369 = vmatprep.subr.mxu1 %v420_v5  ;;  %vm421_vm1 = vmmov 0   ;;  %s422_s0 = smov 126   ;;  %v348_v8 = vld [vmem:[%s517_s2] ss:$0 sm:$0xff]  ;;  %vm245_vm2 = vcmp.gt.f32.partialorder %v27_v0, 0.0  ;;  %vm61_vm3 = vcmask 15360  }
   0x6   :  { %365 = vmatpush3.msk.msra.mxu0 %vm65_vm0, %v53_v6  ;;  %366 = vmatprep.mubr.msk.f32.mxu0 %vm421_vm1, %v420_v5  ;;  %v349_v11 = vld [vmem:[%s518_s3] ss:$0 sm:$0xff]  ;;  %v250_v19 = vand.u32 127, %v249_v18  ;;  %vm258_vm4 = vcmask 64512   ;;  %v423_v37 = vmov 2102212464  }
   0x7   :  { %v244_v7 = vadd.s32 1, %v379_v4  ;;  %371 = vmatprep.mubr.msk.f32.mxu1 %vm421_vm1, %v420_v5  ;;  %v257_v12 = vld [vmem:[%s521_s6] sm:$0xff]  ;;  %v424_v39 = vmov 920167782   ;;  %v425_v43 = vmov 1326507024  }
   0x8   :  { %370 = vmatpush3.msra.mxu1 %v257_v12  ;;  %v351_v22 = vld [vmem:[%s520_s5] ss:$0 sm:$0xff]  ;;  %v426_v45 = vmov 683565275   ;;  %v427_v47 = vmov 2475754826  }
   0x9   :  { %246 = vrot.lane.b32.xlu0 %v244_v7, %s422_s0  ;;  %v428_v50 = vmov 2131351028   ;;  %s429_s5 = smov [#allocation2]  }
   0xa   :  { %s340_s6 = sshll.u32 %s429_s5, 4  ;;  %s341_s6 = int_to_ptr.vmem [resolvable:$true] %s340_s6 }
   0xb   :  { %s397_s11 = scalar_lea.vmem %s341_s6, 128  ;;  %p402_p1 = scmp.lt.s32.totalorder %s341_s6, %s341_s6 }
   0xc   :  { %p398_p0 = scmp.ne.s32.totalorder %s341_s6, %s397_s11  ;;  %p403_p2 = scmp.lt.s32.totalorder %s397_s11, %s397_s11 }
   0xe   :  { %p404_p3 = por %p403_p2, %p402_p1 }
  0x10   :  { %p405_p4 = pnand %p404_p3, %p398_p0 }
  0x7f   :  { %v32_v9 = vpop.permute.xlu0 %31 }
  0x80   :  { %v34_v10 = vmul.f32 %v32_v9, %v28_v1 }
  0x82   :  { %v42_v13 = vmul.f32 %v348_v8, %v34_v10 }
  0x83   :  { %v247_v14 = vpop.permute.xlu0 %246 }
  0x84   :  { %v50_v15 = vadd.f32 %v349_v11, %v42_v13  ;;  %v248_v16 = vsel %vm245_vm2, %v247_v14, 0 }
  0x85   :  { %252 = vperm.xlu1 %392, %v248_v16  }
  0x86   :  { %v350_v17 = vclamps-f32 %v50_v15, 1.0 }
  0x88   :  { %367 = vmatmul.mubr.msk.f32.vlgmr.msra.gmra.mxu0 %vm61_vm3, %v350_v17 }
 0x100   :  { %v253_v20 = vpop.permute.xlu1 %252 }
 0x101   :  { %vm254_vm5 = vcmp.eq.s32.totalorder %v250_v19, %v253_v20 }
 0x102   :  { %v358_v21 = vsel %vm254_vm5, 1.0, %v420_v5 }
 0x103   :  { %372 = vmatmul.mubr.msk.f32.vlgmr.msra.gmra.mxu1 %vm258_vm4, %v358_v21 }
 0x148   :  { %v135_v23 = vpop.f32.mrf.mxu0 }
 0x149   :  { %v491_v24 = vadd.f32 %v351_v22, %v135_v23 }
 0x14a   :  { %v368_v25 = vpop.f32.mrf.mxu0 }
 0x14b   :  { %v142_v26 = vand.u32 2139095040, %v491_v24  ;;  %v139_v27 = vand.u32 2147483647, %v491_v24  ;;  %vm141_vm13 = vcmp.lt.s32.totalorder %v491_v24, 0  ;;  %vm231_vm2 = vweird.f32 %v491_v24 }
 0x14d   :  { %v143_v28 = vshrl.u32 %v142_v26, 23  ;;  %v146_v30 = vand.u32 8388607, %v139_v27  ;;  %vm140_vm14 = vcmp.le.f32.partialorder %v139_v27, 0.7853982 }
 0x14f   :  { %v354_v29 = vadd.s32 4294967169, %v143_v28  ;;  %v147_v33 = vor.u32 8388608, %v146_v30 }
 0x151   :  { %v149_v31 = vadd.s32 1, %v354_v29  ;;  %v187_v41 = vshll.u32 %v147_v33, 8 }
 0x153   :  { %vm150_vm6 = vcmp.gt.s32.totalorder %v149_v31, 0 }
 0x154   :  { %v151_v32 = vsel %vm150_vm6, %v149_v31, 0 }
 0x155   :  { %v153_v34 = vand.u32 31, %v151_v32  ;;  %v152_v35 = vshrl.u32 %v151_v32, 5 }
 0x157   :  { %v154_v36 = vsub.s32 32, %v153_v34  ;;  %v165_v38 = vshll.u32 %v423_v37, %v153_v34  ;;  %v168_v40 = vshll.u32 %v424_v39, %v153_v34  ;;  %v156_v46 = vshll.u32 %v426_v45, %v153_v34 }
 0x158   :  { %v159_v49 = vshll.u32 %v427_v47, %v153_v34  ;;  %v162_v52 = vshll.u32 %v428_v50, %v153_v34  ;;  %vm174_vm7 = vcmp.lt.s32.totalorder %v152_v35, 4  ;;  %vm171_vm8 = vcmp.lt.s32.totalorder %v152_v35, 1 }
 0x159   :  { %v166_v42 = vshrl.u32 %v424_v39, %v154_v36  ;;  %v169_v44 = vshrl.u32 %v425_v43, %v154_v36  ;;  %v157_v48 = vshrl.u32 %v427_v47, %v154_v36  ;;  %v160_v51 = vshrl.u32 %v428_v50, %v154_v36 }
 0x15a   :  { %v163_v53 = vshrl.u32 %v423_v37, %v154_v36  ;;  %v155_v57 = vshrl.u32 %v426_v45, %v154_v36  ;;  %vm172_vm9 = vcmp.lt.s32.totalorder %v152_v35, 2  ;;  %vm173_vm10 = vcmp.lt.s32.totalorder %v152_v35, 3 }
 0x15b   :  { %v167_v54 = vor.u32 %v166_v42, %v165_v38  ;;  %v170_v55 = vor.u32 %v169_v44, %v168_v40  ;;  %v158_v56 = vor.u32 %v157_v48, %v156_v46  ;;  %v161_v58 = vor.u32 %v160_v51, %v159_v49 }
 0x15c   :  { %v164_v59 = vor.u32 %v163_v53, %v162_v52 }
 0x15d   :  { %v180_v60 = vsel %vm174_vm7, %v167_v54, 920167782  ;;  %v184_v61 = vsel %vm174_vm7, %v170_v55, 1326507024  ;;  %v179_v63 = vsel %vm171_vm8, %v158_v56, %v161_v58  ;;  %v175_v2 = vsel %vm171_vm8, %v155_v57, %v158_v56 }
 0x15e   :  { %v176_v62 = vsel %vm174_vm7, %v164_v59, 2102212464  ;;  %v181_v0 = vsel %vm173_vm10, %v164_v59, %v180_v60  ;;  %v183_v1 = vsel %vm171_vm8, %v161_v58, %v164_v59  ;;  %v185_v5 = vsel %vm173_vm10, %v167_v54, %v184_v61 }
 0x15f   :  { %v177_v3 = vsel %vm173_vm10, %v161_v58, %v176_v62  ;;  %v182_v4 = vsel %vm172_vm9, %v179_v63, %v181_v0  ;;  %v186_v6 = vsel %vm172_vm9, %v183_v1, %v185_v5 }
 0x160   :  { %v497_v7 = vmul.u32.u64.low %v187_v41, %v182_v4  ;;  %v498_v8 = vmul.u32.u64.high %v187_v41, %v182_v4, %v497_v7  ;;  %v500_v9 = vmul.u32.u64.low %v187_v41, %v186_v6  ;;  %v501_v10 = vmul.u32.u64.high %v187_v41, %v186_v6, %v500_v9 }
 0x161   :  { %v178_v11 = vsel %vm172_vm9, %v175_v2, %v177_v3 }
 0x162   :  { %v197_v12 = vadd.s32 1, %v498_v8  ;;  %v194_v13 = vmul.u32 %v187_v41, %v178_v11  ;;  %vm196_vm11 = vc.u32 %v501_v10, %v497_v7  ;;  %v195_v30 = vadd.s32 %v497_v7, %v501_v10 }
 0x164   :  { %v198_v14 = vsel %vm196_vm11, %v197_v12, %v498_v8 }
 0x165   :  { %v199_v15 = vadd.s32 %v198_v14, %v194_v13 }
 0x167   :  { %v200_v16 = vadd.s32 536870912, %v199_v15 }
 0x169   :  { %v201_v17 = vshrl.u32 %v200_v16, 30 }
 0x16b   :  { %v202_v18 = vshll.u32 %v201_v17, 30  ;;  %v225_v42 = vsub.s32 4, %v201_v17 }
 0x16d   :  { %v203_v19 = vsub.s32 %v199_v15, %v202_v18  ;;  %v226_v43 = vsel %vm141_vm13, %v225_v42, %v201_v17 }
 0x16e   :  { %v228_v44 = vsel %vm140_vm14, 0, %v226_v43 }
 0x16f   :  { %v205_v20 = vsub.s32 0, %v203_v19  ;;  %v232_v45 = vadd.s32 3, %v228_v44 }
 0x171   :  { %v355_v21 = vmin.u32 %v205_v20, %v203_v19  ;;  %v233_v48 = vand.u32 3, %v232_v45 }
 0x173   :  { %v207_v22 = vclz %v355_v21  ;;  %vm235_vm15 = vcmp.eq.s32.totalorder %v233_v48, 0  ;;  %vm238_vm0 = vcmp.eq.s32.totalorder %v233_v48, 2  ;;  %vm234_vm1 = vcmp.lt.s32.totalorder %v233_v48, 2 }
 0x175   :  { %v356_v23 = vadd.s32 4294967294, %v207_v22 }
 0x177   :  { %vm357_vm12 = vcmp.lt.s32.totalorder %v356_v23, 0 }
 0x178   :  { %v210_v25 = vsel %vm357_vm12, 0, %v356_v23 }
 0x179   :  { %v215_v26 = vsub.s32 4294967266, %v210_v25  ;;  %v211_v29 = vsub.s32 32, %v210_v25  ;;  %v212_v33 = vshll.u32 %v203_v19, %v210_v25 }
 0x17b   :  { %v216_v28 = vadd.s32 127, %v215_v26  ;;  %v213_v32 = vshrl.u32 %v195_v30, %v211_v29 }
 0x17d   :  { %v217_v31 = vshll.u32 %v216_v28, 23  ;;  %v214_v35 = vor.u32 %v213_v32, %v212_v33 }
 0x17f   :  { %v218_v34 = vor.u32 4788187, %v217_v31  ;;  %v221_v37 = vcvt.s32.f32 %v214_v35 }
 0x181   :  { %v219_v36 = vand.u32 2147483647, %v218_v34 }
 0x183   :  { %v222_v38 = vmul.f32 %v221_v37, %v219_v36 }
 0x185   :  { %v223_v39 = vxor.u32 2147483648, %v222_v38 }
 0x187   :  { %v224_v40 = vsel %vm141_vm13, %v223_v39, %v222_v38 }
 0x188   :  { %v227_v41 = vsel %vm140_vm14, %v491_v24, %v224_v40 }
 0x189   :  { %393 = vcosq.f32 %v227_v41 }
 0x18a   :  { %395 = vsinq.f32 %v227_v41 }
 0x196   :  { %v394_v46 = vpop.eup %393 }
 0x197   :  { %v396_v47 = vpop.eup %395  ;;  %v239_v50 = vxor.u32 2147483648, %v394_v46 }
 0x198   :  { %v236_v49 = vxor.u32 2147483648, %v396_v47 }
 0x199   :  { %v240_v52 = vsel %vm238_vm0, %v239_v50, %v396_v47 }
 0x19a   :  { %v237_v51 = vsel %vm235_vm15, %v394_v46, %v236_v49 }
 0x19b   :  { %v241_v53 = vsel %vm234_vm1, %v237_v51, %v240_v52 }
 0x19c   :  { %v242_v27 = vsel %vm231_vm2, nan, %v241_v53 }
 0x1c3   :  { %v328_v54 = vpop.f32.mrf.mxu1 }
 0x1c4   :  { %v332_v55 = vadd.f32 %v328_v54, %v242_v27 }
 0x1c5   :  { %v373_v56 = vpop.f32.mrf.mxu1 }
 0x1c6   :  { %333 = vst [vmem:[#allocation2] sm:$0xff] %v332_v55 }
 0x1c7   :  { %408 = shalt.err (!%p405_p4)
}
 0x1c8   :  { %343 = dma.vmem_to_hbm [thread:$0]  %s341_s6, 128, %s522_s7, [#allocation3]  }
 0x1c9   :  { %417 = dma.done.wait [#allocation3], 128  }
 0x1ca   :  { %418 = vsyncadd [#allocation3], 4294967168 }
 0x1cb   :  { %347 = vsyncpa [#allocation3], 1 }

</bundles_post_ra>
